<compile_context>
chip_gen: v5e
topology: v5e:2x2
jax: 0.10.0
libtpu: 0.0.40
codegen_flags: <defaults>
</compile_context>

<pallas_src>
import jax
import jax.numpy as jnp
from jax.experimental import pallas as pl
from jax.experimental.pallas import tpu as pltpu

LANES = 128
SUBLANES = 8


def _make_loss_all_kernel(row_tile, nb, valid_rows_last):
    """row_tile: rows per block (mult of 8); nb: # real row-blocks;
    valid_rows_last: valid rows inside the last real block."""
    r8 = row_tile // SUBLANES

    def kernel(x_ref, t_ref, o_ref, tp_acc, mt_acc, st_acc):
        c = pl.program_id(0)            # TensorCore split (parallel)
        k = pl.program_id(1)            # reduction steps (arbitrary)
        nk = pl.num_programs(1)
        gb = c * nk + k                 # global row-block index

        @pl.when(k == 0)
        def _init():
            tp_acc[...] = jnp.zeros_like(tp_acc)
            mt_acc[...] = jnp.zeros_like(mt_acc)
            st_acc[...] = jnp.zeros_like(st_acc)

        def accumulate(valid_rows):
            x = x_ref[...]                                  # native dtype
            t = t_ref[...].astype(jnp.float32)              # 0/1 exact in any dtype
            pred = jnp.where(x >= 0.5, 1.0, 0.0)            # threshold
            eq = pred == t                                  # prediction matches target
            tp_inc = jnp.where(eq, t, 0.0)                  # matches with target == 1
            mt_inc = jnp.where(eq, 1.0, 0.0)                # all matches
            st_inc = t                                      # running sum of targets
            if valid_rows is not None:                      # last block only
                tp_inc = jnp.where(valid_rows, tp_inc, 0.0)
                mt_inc = jnp.where(valid_rows, mt_inc, 0.0)
                st_inc = jnp.where(valid_rows, st_inc, 0.0)
            # Per-sublane (8,128) partials: pure VALU vreg adds in the hot
            # loop; no cross-sublane XLU reduce until finalize.
            tp_acc[...] += jnp.sum(tp_inc.reshape(r8, SUBLANES, LANES), axis=0)
            mt_acc[...] += jnp.sum(mt_inc.reshape(r8, SUBLANES, LANES), axis=0)
            st_acc[...] += jnp.sum(st_inc.reshape(r8, SUBLANES, LANES), axis=0)

        # Interior blocks: no per-element masking at all.
        @pl.when(gb < nb - 1)
        def _full():
            accumulate(None)

        # Last real block: mask rows past the end of the 128-wide row array
        # (block padding past the array holds garbage).  Blocks with gb >= nb
        # are phantom (odd block count under the 2-way core split) -> skipped.
        @pl.when(gb == nb - 1)
        def _last():
            rid = jax.lax.broadcasted_iota(jnp.int32, (row_tile, LANES), 0)
            accumulate(rid < valid_rows_last)

        @pl.when(k == nk - 1)
        def _finalize():
            tp = jnp.sum(tp_acc[...])
            mt = jnp.sum(mt_acc[...])
            st = jnp.sum(st_acc[...])
            lane = jax.lax.broadcasted_iota(jnp.int32, (1, SUBLANES, LANES), 2)
            o_ref[...] = jnp.where(lane == 0, tp,
                         jnp.where(lane == 1, mt,
                         jnp.where(lane == 2, st, 0.0)))    # lane-dense (1,8,128) store

    return kernel


def loss_all_pallas(inputs, targets, *, max_row_tile=2048):
    """Returns (precision, recall, FPR, FNR) matching Loss_all.forward."""
    x = inputs.reshape(-1)                  # keep native dtype (0.5 threshold exact)
    t = targets.reshape(-1)                 # keep native dtype (cast in-kernel)
    n = x.shape[0]

    rows = -(-n // LANES)                   # ceil(n / 128)
    p128 = rows * LANES - n                 # pad only to a 128 multiple,
    if p128:                                # and only if actually needed
        x = jnp.pad(x, (0, p128))
        t = jnp.pad(t, (0, p128))
    x2 = x.reshape(rows, LANES)
    t2 = t.reshape(rows, LANES)

    row_tile = min(max_row_tile, -(-rows // SUBLANES) * SUBLANES)   # multiple of 8
    nb = -(-rows // row_tile)               # real row-blocks
    nk = -(-nb // 2)                        # blocks per core (2-way split)
    valid_rows_last = rows - (nb - 1) * row_tile

    # Clamp phantom block indices (when nb is odd) so the window stays in-bounds.
    idx_map = lambda c, k: (jnp.minimum(c * nk + k, nb - 1), 0)

    out = pl.pallas_call(
        _make_loss_all_kernel(row_tile, nb, valid_rows_last),
        out_shape=jax.ShapeDtypeStruct((2, SUBLANES, LANES), jnp.float32),
        grid=(2, nk),
        in_specs=[pl.BlockSpec((row_tile, LANES), idx_map),
                  pl.BlockSpec((row_tile, LANES), idx_map)],
        out_specs=pl.BlockSpec((1, SUBLANES, LANES), lambda c, k: (c, 0, 0)),
        scratch_shapes=[pltpu.VMEM((SUBLANES, LANES), jnp.float32),
                        pltpu.VMEM((SUBLANES, LANES), jnp.float32),
                        pltpu.VMEM((SUBLANES, LANES), jnp.float32)],
        compiler_params=pltpu.CompilerParams(
            dimension_semantics=("parallel", "arbitrary")),   # 2 TCs x reduction
    )(x2, t2)

    # Combine the two per-core partials; tiny scalar epilogue.
    tp = out[0, 0, 0] + out[1, 0, 0]
    mt = out[0, 0, 1] + out[1, 0, 1] - jnp.float32(p128)  # wrapper zero-pad counts as matches
    st = out[0, 0, 2] + out[1, 0, 2]
    fp = st - tp                         # mismatches with target == 1
    tn = mt - tp                         # matches with target == 0
    fn = (jnp.float32(n) - mt) - fp      # mismatches with target == 0
    precision = tp / (tp + fp)
    recall = tp / (tp + fn)
    fpr = fp / (fp + tn)
    fnr = fn / (fn + tp)
    return precision, recall, fpr, fnr


def loss_all_ref(inputs, targets):
    """Pure-JAX reference with identical semantics (for validation)."""
    x = inputs.astype(jnp.float32).reshape(-1)
    t = targets.astype(jnp.float32).reshape(-1)
    pred = jnp.where(x >= 0.5, 1.0, 0.0)
    match = (pred == t)
    n = jnp.float32(x.shape[0])
    tp = jnp.sum(jnp.where(match, t, 0.0))
    n_match = jnp.sum(match.astype(jnp.float32))
    tn = n_match - tp
    fp = jnp.sum(jnp.where(match, 0.0, t))
    fn = (n - n_match) - fp
    return tp / (tp + fp), tp / (tp + fn), fp / (fp + tn), fn / (fn + tp)


if __name__ == "__main__":
    key = jax.random.PRNGKey(0)
    k_in, k_tg = jax.random.split(key)

    # Small segmentation-style prediction/target pair.
    B, C, H, W = 2, 4, 16, 16
    inputs = jax.random.uniform(k_in, (B, C, H, W), jnp.float32)                    # probabilities
    targets = (jax.random.uniform(k_tg, (B, C, H, W)) >= 0.5).astype(jnp.float32)   # binary labels

    loss_all = jax.jit(loss_all_pallas)
    metrics = loss_all(inputs, targets)
    jax.block_until_ready(metrics)

    ref = loss_all_ref(inputs, targets)
    got = jnp.stack(list(metrics))
    exp = jnp.stack(list(ref))
    assert bool(jnp.allclose(got, exp, rtol=1e-5, atol=1e-6, equal_nan=True)), (got, exp)

    print("KERNEL_OK")
</pallas_src>

<mosaic_0001>
module attributes {stable_mosaic.version = 11 : i64} {
  func.func @kernel(%arg0: i32, %arg1: i32, %arg2: memref<16x128xf32, #tpu.memory_space<vmem>>, %arg3: memref<16x128xf32, #tpu.memory_space<vmem>>, %arg4: memref<1x8x128xf32, #tpu.memory_space<vmem>>, %arg5: memref<8x128xf32, #tpu.memory_space<vmem>>, %arg6: memref<8x128xf32, #tpu.memory_space<vmem>>, %arg7: memref<8x128xf32, #tpu.memory_space<vmem>>) attributes {dimension_semantics = [#tpu.dimension_semantics<parallel>, #tpu.dimension_semantics<arbitrary>], iteration_bounds = array<i64: 2, 1>, scalar_prefetch = 0 : i64, scratch_operands = 3 : i64, tpu.core_type = #tpu.core_type<tc>, window_params = [{transform_indices = @transform_0, window_bounds = array<i64: 16, 128>}, {transform_indices = @transform_1, window_bounds = array<i64: 16, 128>}, {transform_indices = @transform_2, window_bounds = array<i64: 1, 8, 128>}]} {
    %c1_i32 = arith.constant 1 : i32
    %0 = arith.muli %arg0, %c1_i32 : i32
    %1 = arith.addi %0, %arg1 : i32
    %c0_i32 = arith.constant 0 : i32
    %2 = arith.cmpi eq, %arg1, %c0_i32 : i32
    %3 = arith.extui %2 : i1 to i32
    %c0_i32_0 = arith.constant 0 : i32
    %4 = arith.cmpi ne, %3, %c0_i32_0 : i32
    scf.if %4 {
      %cst = arith.constant 0.000000e+00 : f32
      %14 = vector.broadcast %cst : f32 to vector<8x128xf32>
      %c0 = arith.constant 0 : index
      %c0_7 = arith.constant 0 : index
      %15 = vector.load %arg5[%c0, %c0_7] : memref<8x128xf32, #tpu.memory_space<vmem>>, vector<8x128xf32>
      tpu.vector_store %arg5[%c0, %c0_7], %14 {strides = array<i32>} : memref<8x128xf32, #tpu.memory_space<vmem>>, vector<8x128xf32>,
      %cst_8 = arith.constant 0.000000e+00 : f32
      %16 = vector.broadcast %cst_8 : f32 to vector<8x128xf32>
      %c0_9 = arith.constant 0 : index
      %c0_10 = arith.constant 0 : index
      %17 = vector.load %arg6[%c0_9, %c0_10] : memref<8x128xf32, #tpu.memory_space<vmem>>, vector<8x128xf32>
      tpu.vector_store %arg6[%c0_9, %c0_10], %16 {strides = array<i32>} : memref<8x128xf32, #tpu.memory_space<vmem>>, vector<8x128xf32>,
      %cst_11 = arith.constant 0.000000e+00 : f32
      %18 = vector.broadcast %cst_11 : f32 to vector<8x128xf32>
      %c0_12 = arith.constant 0 : index
      %c0_13 = arith.constant 0 : index
      %19 = vector.load %arg7[%c0_12, %c0_13] : memref<8x128xf32, #tpu.memory_space<vmem>>, vector<8x128xf32>
      tpu.vector_store %arg7[%c0_12, %c0_13], %18 {strides = array<i32>} : memref<8x128xf32, #tpu.memory_space<vmem>>, vector<8x128xf32>,
    } else {
    }
    %c0_i32_1 = arith.constant 0 : i32
    %5 = arith.cmpi slt, %1, %c0_i32_1 : i32
    %6 = arith.extui %5 : i1 to i32
    %c0_i32_2 = arith.constant 0 : i32
    %7 = arith.cmpi ne, %6, %c0_i32_2 : i32
    scf.if %7 {
      %c0 = arith.constant 0 : index
      %c0_7 = arith.constant 0 : index
      %14 = vector.load %arg2[%c0, %c0_7] : memref<16x128xf32, #tpu.memory_space<vmem>>, vector<16x128xf32>
      %c0_8 = arith.constant 0 : index
      %c0_9 = arith.constant 0 : index
      %15 = vector.load %arg3[%c0_8, %c0_9] : memref<16x128xf32, #tpu.memory_space<vmem>>, vector<16x128xf32>
      %cst = arith.constant 5.000000e-01 : f32
      %16 = vector.broadcast %cst : f32 to vector<16x128xf32>
      %17 = arith.cmpf oge, %14, %16 : vector<16x128xf32>
      %cst_10 = arith.constant 1.000000e+00 : f32
      %cst_11 = arith.constant 0.000000e+00 : f32
      %18 = vector.broadcast %cst_10 : f32 to vector<16x128xf32>
      %19 = vector.broadcast %cst_11 : f32 to vector<16x128xf32>
      %20 = arith.select %17, %18, %19 : vector<16x128xi1>, vector<16x128xf32>
      %21 = arith.cmpf oeq, %20, %15 : vector<16x128xf32>
      %cst_12 = arith.constant 0.000000e+00 : f32
      %22 = vector.broadcast %cst_12 : f32 to vector<16x128xf32>
      %23 = arith.select %21, %15, %22 : vector<16x128xi1>, vector<16x128xf32>
      %cst_13 = arith.constant 1.000000e+00 : f32
      %cst_14 = arith.constant 0.000000e+00 : f32
      %24 = vector.broadcast %cst_13 : f32 to vector<16x128xf32>
      %25 = vector.broadcast %cst_14 : f32 to vector<16x128xf32>
      %26 = arith.select %21, %24, %25 : vector<16x128xi1>, vector<16x128xf32>
      %c0_15 = arith.constant 0 : index
      %c0_16 = arith.constant 0 : index
      %27 = vector.load %arg5[%c0_15, %c0_16] : memref<8x128xf32, #tpu.memory_space<vmem>>, vector<8x128xf32>
      %28 = vector.shape_cast %23 : vector<16x128xf32> to vector<2x8x128xf32>
      %cst_17 = arith.constant dense<0.000000e+00> : vector<8x128xf32>
      %29 = vector.multi_reduction <add>, %28, %cst_17 [0] : vector<2x8x128xf32> to vector<8x128xf32>
      %30 = arith.addf %27, %29 : vector<8x128xf32>
      %c0_18 = arith.constant 0 : index
      %c0_19 = arith.constant 0 : index
      %31 = vector.load %arg5[%c0_18, %c0_19] : memref<8x128xf32, #tpu.memory_space<vmem>>, vector<8x128xf32>
      tpu.vector_store %arg5[%c0_18, %c0_19], %30 {strides = array<i32>} : memref<8x128xf32, #tpu.memory_space<vmem>>, vector<8x128xf32>,
      %c0_20 = arith.constant 0 : index
      %c0_21 = arith.constant 0 : index
      %32 = vector.load %arg6[%c0_20, %c0_21] : memref<8x128xf32, #tpu.memory_space<vmem>>, vector<8x128xf32>
      %33 = vector.shape_cast %26 : vector<16x128xf32> to vector<2x8x128xf32>
      %cst_22 = arith.constant dense<0.000000e+00> : vector<8x128xf32>
      %34 = vector.multi_reduction <add>, %33, %cst_22 [0] : vector<2x8x128xf32> to vector<8x128xf32>
      %35 = arith.addf %32, %34 : vector<8x128xf32>
      %c0_23 = arith.constant 0 : index
      %c0_24 = arith.constant 0 : index
      %36 = vector.load %arg6[%c0_23, %c0_24] : memref<8x128xf32, #tpu.memory_space<vmem>>, vector<8x128xf32>
      tpu.vector_store %arg6[%c0_23, %c0_24], %35 {strides = array<i32>} : memref<8x128xf32, #tpu.memory_space<vmem>>, vector<8x128xf32>,
      %c0_25 = arith.constant 0 : index
      %c0_26 = arith.constant 0 : index
      %37 = vector.load %arg7[%c0_25, %c0_26] : memref<8x128xf32, #tpu.memory_space<vmem>>, vector<8x128xf32>
      %38 = vector.shape_cast %15 : vector<16x128xf32> to vector<2x8x128xf32>
      %cst_27 = arith.constant dense<0.000000e+00> : vector<8x128xf32>
      %39 = vector.multi_reduction <add>, %38, %cst_27 [0] : vector<2x8x128xf32> to vector<8x128xf32>
      %40 = arith.addf %37, %39 : vector<8x128xf32>
      %c0_28 = arith.constant 0 : index
      %c0_29 = arith.constant 0 : index
      %41 = vector.load %arg7[%c0_28, %c0_29] : memref<8x128xf32, #tpu.memory_space<vmem>>, vector<8x128xf32>
      tpu.vector_store %arg7[%c0_28, %c0_29], %40 {strides = array<i32>} : memref<8x128xf32, #tpu.memory_space<vmem>>, vector<8x128xf32>,
    } else {
    }
    %c0_i32_3 = arith.constant 0 : i32
    %8 = arith.cmpi eq, %1, %c0_i32_3 : i32
    %9 = arith.extui %8 : i1 to i32
    %c0_i32_4 = arith.constant 0 : i32
    %10 = arith.cmpi ne, %9, %c0_i32_4 : i32
    scf.if %10 {
      %14 = tpu.iota {dimensions = array<i32: 0>} : vector<16x128xi32>
      %c16_i32 = arith.constant 16 : i32
      %15 = vector.broadcast %c16_i32 : i32 to vector<16x128xi32>
      %16 = arith.cmpi slt, %14, %15 : vector<16x128xi32>
      %c0 = arith.constant 0 : index
      %c0_7 = arith.constant 0 : index
      %17 = vector.load %arg2[%c0, %c0_7] : memref<16x128xf32, #tpu.memory_space<vmem>>, vector<16x128xf32>
      %c0_8 = arith.constant 0 : index
      %c0_9 = arith.constant 0 : index
      %18 = vector.load %arg3[%c0_8, %c0_9] : memref<16x128xf32, #tpu.memory_space<vmem>>, vector<16x128xf32>
      %cst = arith.constant 5.000000e-01 : f32
      %19 = vector.broadcast %cst : f32 to vector<16x128xf32>
      %20 = arith.cmpf oge, %17, %19 : vector<16x128xf32>
      %cst_10 = arith.constant 1.000000e+00 : f32
      %cst_11 = arith.constant 0.000000e+00 : f32
      %21 = vector.broadcast %cst_10 : f32 to vector<16x128xf32>
      %22 = vector.broadcast %cst_11 : f32 to vector<16x128xf32>
      %23 = arith.select %20, %21, %22 : vector<16x128xi1>, vector<16x128xf32>
      %24 = arith.cmpf oeq, %23, %18 : vector<16x128xf32>
      %cst_12 = arith.constant 0.000000e+00 : f32
      %25 = vector.broadcast %cst_12 : f32 to vector<16x128xf32>
      %26 = arith.select %24, %18, %25 : vector<16x128xi1>, vector<16x128xf32>
      %cst_13 = arith.constant 1.000000e+00 : f32
      %cst_14 = arith.constant 0.000000e+00 : f32
      %27 = vector.broadcast %cst_13 : f32 to vector<16x128xf32>
      %28 = vector.broadcast %cst_14 : f32 to vector<16x128xf32>
      %29 = arith.select %24, %27, %28 : vector<16x128xi1>, vector<16x128xf32>
      %cst_15 = arith.constant 0.000000e+00 : f32
      %30 = vector.broadcast %cst_15 : f32 to vector<16x128xf32>
      %31 = arith.select %16, %26, %30 : vector<16x128xi1>, vector<16x128xf32>
      %cst_16 = arith.constant 0.000000e+00 : f32
      %32 = vector.broadcast %cst_16 : f32 to vector<16x128xf32>
      %33 = arith.select %16, %29, %32 : vector<16x128xi1>, vector<16x128xf32>
      %cst_17 = arith.constant 0.000000e+00 : f32
      %34 = vector.broadcast %cst_17 : f32 to vector<16x128xf32>
      %35 = arith.select %16, %18, %34 : vector<16x128xi1>, vector<16x128xf32>
      %c0_18 = arith.constant 0 : index
      %c0_19 = arith.constant 0 : index
      %36 = vector.load %arg5[%c0_18, %c0_19] : memref<8x128xf32, #tpu.memory_space<vmem>>, vector<8x128xf32>
      %37 = vector.shape_cast %31 : vector<16x128xf32> to vector<2x8x128xf32>
      %cst_20 = arith.constant dense<0.000000e+00> : vector<8x128xf32>
      %38 = vector.multi_reduction <add>, %37, %cst_20 [0] : vector<2x8x128xf32> to vector<8x128xf32>
      %39 = arith.addf %36, %38 : vector<8x128xf32>
      %c0_21 = arith.constant 0 : index
      %c0_22 = arith.constant 0 : index
      %40 = vector.load %arg5[%c0_21, %c0_22] : memref<8x128xf32, #tpu.memory_space<vmem>>, vector<8x128xf32>
      tpu.vector_store %arg5[%c0_21, %c0_22], %39 {strides = array<i32>} : memref<8x128xf32, #tpu.memory_space<vmem>>, vector<8x128xf32>,
      %c0_23 = arith.constant 0 : index
      %c0_24 = arith.constant 0 : index
      %41 = vector.load %arg6[%c0_23, %c0_24] : memref<8x128xf32, #tpu.memory_space<vmem>>, vector<8x128xf32>
      %42 = vector.shape_cast %33 : vector<16x128xf32> to vector<2x8x128xf32>
      %cst_25 = arith.constant dense<0.000000e+00> : vector<8x128xf32>
      %43 = vector.multi_reduction <add>, %42, %cst_25 [0] : vector<2x8x128xf32> to vector<8x128xf32>
      %44 = arith.addf %41, %43 : vector<8x128xf32>
      %c0_26 = arith.constant 0 : index
      %c0_27 = arith.constant 0 : index
      %45 = vector.load %arg6[%c0_26, %c0_27] : memref<8x128xf32, #tpu.memory_space<vmem>>, vector<8x128xf32>
      tpu.vector_store %arg6[%c0_26, %c0_27], %44 {strides = array<i32>} : memref<8x128xf32, #tpu.memory_space<vmem>>, vector<8x128xf32>,
      %c0_28 = arith.constant 0 : index
      %c0_29 = arith.constant 0 : index
      %46 = vector.load %arg7[%c0_28, %c0_29] : memref<8x128xf32, #tpu.memory_space<vmem>>, vector<8x128xf32>
      %47 = vector.shape_cast %35 : vector<16x128xf32> to vector<2x8x128xf32>
      %cst_30 = arith.constant dense<0.000000e+00> : vector<8x128xf32>
      %48 = vector.multi_reduction <add>, %47, %cst_30 [0] : vector<2x8x128xf32> to vector<8x128xf32>
      %49 = arith.addf %46, %48 : vector<8x128xf32>
      %c0_31 = arith.constant 0 : index
      %c0_32 = arith.constant 0 : index
      %50 = vector.load %arg7[%c0_31, %c0_32] : memref<8x128xf32, #tpu.memory_space<vmem>>, vector<8x128xf32>
      tpu.vector_store %arg7[%c0_31, %c0_32], %49 {strides = array<i32>} : memref<8x128xf32, #tpu.memory_space<vmem>>, vector<8x128xf32>,
    } else {
    }
    %c0_i32_5 = arith.constant 0 : i32
    %11 = arith.cmpi eq, %arg1, %c0_i32_5 : i32
    %12 = arith.extui %11 : i1 to i32
    %c0_i32_6 = arith.constant 0 : i32
    %13 = arith.cmpi ne, %12, %c0_i32_6 : i32
    scf.if %13 {
      %c0 = arith.constant 0 : index
      %c0_7 = arith.constant 0 : index
      %14 = vector.load %arg5[%c0, %c0_7] : memref<8x128xf32, #tpu.memory_space<vmem>>, vector<8x128xf32>
      %15 = vector.shape_cast %14 : vector<8x128xf32> to vector<1x8x128xf32>
      %cst = arith.constant dense<0.000000e+00> : vector<1xf32>
      %16 = vector.multi_reduction <add>, %15, %cst [1, 2] : vector<1x8x128xf32> to vector<1xf32>
      %17 = vector.shape_cast %16 : vector<1xf32> to vector<1x1x1xf32>
      %18 = vector.extract %17[0, 0, 0] : f32 from vector<1x1x1xf32>
      %c0_8 = arith.constant 0 : index
      %c0_9 = arith.constant 0 : index
      %19 = vector.load %arg6[%c0_8, %c0_9] : memref<8x128xf32, #tpu.memory_space<vmem>>, vector<8x128xf32>
      %20 = vector.shape_cast %19 : vector<8x128xf32> to vector<1x8x128xf32>
      %cst_10 = arith.constant dense<0.000000e+00> : vector<1xf32>
      %21 = vector.multi_reduction <add>, %20, %cst_10 [1, 2] : vector<1x8x128xf32> to vector<1xf32>
      %22 = vector.shape_cast %21 : vector<1xf32> to vector<1x1x1xf32>
      %23 = vector.extract %22[0, 0, 0] : f32 from vector<1x1x1xf32>
      %c0_11 = arith.constant 0 : index
      %c0_12 = arith.constant 0 : index
      %24 = vector.load %arg7[%c0_11, %c0_12] : memref<8x128xf32, #tpu.memory_space<vmem>>, vector<8x128xf32>
      %25 = vector.shape_cast %24 : vector<8x128xf32> to vector<1x8x128xf32>
      %cst_13 = arith.constant dense<0.000000e+00> : vector<1xf32>
      %26 = vector.multi_reduction <add>, %25, %cst_13 [1, 2] : vector<1x8x128xf32> to vector<1xf32>
      %27 = vector.shape_cast %26 : vector<1xf32> to vector<1x1x1xf32>
      %28 = vector.extract %27[0, 0, 0] : f32 from vector<1x1x1xf32>
      %29 = tpu.iota {dimensions = array<i32: 2>} : vector<1x8x128xi32>
      %c0_i32_14 = arith.constant 0 : i32
      %30 = vector.broadcast %c0_i32_14 : i32 to vector<1x8x128xi32>
      %31 = arith.cmpi eq, %29, %30 : vector<1x8x128xi32>
      %c1_i32_15 = arith.constant 1 : i32
      %32 = vector.broadcast %c1_i32_15 : i32 to vector<1x8x128xi32>
      %33 = arith.cmpi eq, %29, %32 : vector<1x8x128xi32>
      %c2_i32 = arith.constant 2 : i32
      %34 = vector.broadcast %c2_i32 : i32 to vector<1x8x128xi32>
      %35 = arith.cmpi eq, %29, %34 : vector<1x8x128xi32>
      %cst_16 = arith.constant 0.000000e+00 : f32
      %36 = vector.broadcast %28 : f32 to vector<1x8x128xf32>
      %37 = vector.broadcast %cst_16 : f32 to vector<1x8x128xf32>
      %38 = arith.select %35, %36, %37 : vector<1x8x128xi1>, vector<1x8x128xf32>
      %39 = vector.broadcast %23 : f32 to vector<1x8x128xf32>
      %40 = arith.select %33, %39, %38 : vector<1x8x128xi1>, vector<1x8x128xf32>
      %41 = vector.broadcast %18 : f32 to vector<1x8x128xf32>
      %42 = arith.select %31, %41, %40 : vector<1x8x128xi1>, vector<1x8x128xf32>
      %c0_17 = arith.constant 0 : index
      %c0_18 = arith.constant 0 : index
      %c0_19 = arith.constant 0 : index
      %43 = vector.load %arg4[%c0_17, %c0_18, %c0_19] : memref<1x8x128xf32, #tpu.memory_space<vmem>>, vector<1x8x128xf32>
      tpu.vector_store %arg4[%c0_17, %c0_18, %c0_19], %42 {strides = array<i32>} : memref<1x8x128xf32, #tpu.memory_space<vmem>>, vector<1x8x128xf32>,
    } else {
    }
    return
  }
  func.func @transform_0(%arg0: i32, %arg1: i32) -> (i32, i32) {
    %c1_i32 = arith.constant 1 : i32
    %0 = arith.muli %arg0, %c1_i32 : i32
    %1 = arith.addi %0, %arg1 : i32
    %c0_i32 = arith.constant 0 : i32
    %2 = arith.minsi %1, %c0_i32 : i32
    %c0_i32_0 = arith.constant 0 : i32
    %c0_i32_1 = arith.constant 0 : i32
    return %2, %c0_i32_0 : i32, i32
  }
  func.func @transform_1(%arg0: i32, %arg1: i32) -> (i32, i32) {
    %c1_i32 = arith.constant 1 : i32
    %0 = arith.muli %arg0, %c1_i32 : i32
    %1 = arith.addi %0, %arg1 : i32
    %c0_i32 = arith.constant 0 : i32
    %2 = arith.minsi %1, %c0_i32 : i32
    %c0_i32_0 = arith.constant 0 : i32
    %c0_i32_1 = arith.constant 0 : i32
    return %2, %c0_i32_0 : i32, i32
  }
  func.func @transform_2(%arg0: i32, %arg1: i32) -> (i32, i32, i32) {
    %c0_i32 = arith.constant 0 : i32
    %c0_i32_0 = arith.constant 0 : i32
    %c0_i32_1 = arith.constant 0 : i32
    return %arg0, %c0_i32, %c0_i32_0 : i32, i32, i32
  }
}

</mosaic_0001>

<bundles_post_ra>
// kernel: loss_all_pallas.1
= control target key start
LH: loop header
LB: loop body
LE: loop exit
PB: predicated region body
PF: predicated region fallthrough
CT: control target
= control target key end

     0   :  { %s506_s9 = smov 0   ;;  %s508_s10 = smov 0   ;;  %s565_s0 = inlined_call_operand.vmem [shape: f32[16,128], index: 0, kind: input, shape index: {}]   ;;  %s566_s1 = inlined_call_operand.vmem [shape: f32[16,128], index: 1, kind: input, shape index: {}]   ;;  %s567_s2 = inlined_call_operand.vmem [shape: f32[2,8,128], index: 2, kind: output, shape index: {}]  }
   0x1   :  { %s510_s11 = smov 0  }
   0x2 LB: > { %s24_s12 = sadd.s32 1, %s482_s10  ;;  %p421_p0 = scmp.ge.s32.totalorder %s486_s11, 1  ;;  %s486_s11 = sphi %s510_s11, %s12_s11   ;;  %s482_s10 = sphi %s508_s10, %s569_s10   ;;  %s478_s9 = sphi %s506_s9, %s568_s9  }
   0x3   : > { %p26_p1 = scmp.ge.s32.totalorder %s24_s12, 2  ;;  %p160_p2 = scmp.lt.s32.totalorder %s486_s11, 3 }
   0x5   : > { %s571_s12 = smov (%p26_p1, %s24_s12), 0  ;;  %p161_p3 = pnand %p421_p0, %p160_p2 }
   0x6   : > { %p193_p4 = scmp.lt.s32.totalorder (!%p161_p3), %s478_s9, 0  ;;  %p216_p5 = scmp.lt.s32.totalorder (!%p161_p3), %s478_s9, 1 }
   0x7   : > { %164 = sbr.rel (%p161_p3) target bundleno = 248 (0xf8), region = 28  ;;  %p427_p7 = scmp.ge.s32.totalorder (!%p161_p3), %s478_s9, 0 }
   0xc   : > { %v488_v0 = vmov 0.0   ;;  %s194_s13 = scalar_select %p193_p4, %s478_s9, 0 }
   0xd   : > { %225 = vst [vmem:[#allocation2] sm:$0xff] %v488_v0  ;;  %s217_s14 = scalar_select %p216_p5, %s478_s9, 1 }
   0xe   : > { %226 = vst [vmem:[#allocation3] sm:$0xff] %v488_v0  ;;  %s422_s15 = sshll.u32 %s194_s13, 1 }
   0xf   : > { %227 = vst [vmem:[#allocation4] sm:$0xff] %v488_v0  ;;  %p196_p6 = scmp.lt.s32.totalorder %s422_s15, 1  ;;  %s426_s16 = sshll.u32 %s217_s14, 3 }
  0x10   : > { %s533_s19 = scalar_lea.vmem %s567_s2, %s426_s16  ;;  %231 = sbr.rel (%p427_p7) target bundleno = 32 (0x20), region = 36 }
  0x11   : > { %s573_s15 = smov (!%p196_p6, %s422_s15), 1 }
  0x12   : > { %s423_s20 = sshll.u32 %s573_s15, 3 }
  0x13   : > { %s538_s23 = scalar_lea.vmem %s565_s0, %s423_s20  ;;  %s543_s26 = scalar_lea.vmem %s566_s1, %s423_s20 }
  0x15   : > { %v232_v1 = vld [vmem:[%s538_s23] sm:$0xff]  ;;  %v233_v2 = vld [vmem:[%s538_s23 + $0x8] sm:$0xff]  ;;  %v489_v5 = vmov 0.0  }
  0x16   : > { %v234_v3 = vld [vmem:[%s543_s26] sm:$0xff]  ;;  %v235_v4 = vld [vmem:[%s543_s26 + $0x8] sm:$0xff]  ;;  %vm236_vm0 = vcmp.ge.f32.partialorder %v232_v1, 0.5  ;;  %vm237_vm1 = vcmp.ge.f32.partialorder %v233_v2, 0.5  ;;  %v254_v8 = vld [vmem:[#allocation4] sm:$0xff] }
  0x17   : > { %v238_v6 = vsel %vm236_vm0, 1.0, %v489_v5  ;;  %v239_v7 = vsel %vm237_vm1, 1.0, %v489_v5  ;;  %v255_v9 = vadd.f32 %v235_v4, %v234_v3  ;;  %v246_v12 = vld [vmem:[#allocation2] sm:$0xff]  ;;  %v250_v15 = vld [vmem:[#allocation3] sm:$0xff] }
  0x18   : > { %vm240_vm2 = vcmp.eq.f32.partialorder %v238_v6, %v234_v3  ;;  %vm241_vm3 = vcmp.eq.f32.partialorder %v239_v7, %v235_v4 }
  0x19   : > { %v242_v10 = vsel %vm240_vm2, %v234_v3, 0.0  ;;  %v243_v11 = vsel %vm241_vm3, %v235_v4, 0.0  ;;  %v244_v13 = vsel %vm240_vm2, 1.0, %v489_v5  ;;  %v245_v14 = vsel %vm241_vm3, 1.0, %v489_v5 }
  0x1a   : > { %v247_v16 = vadd.f32 %v243_v11, %v242_v10  ;;  %v251_v17 = vadd.f32 %v245_v14, %v244_v13  ;;  %v256_v18 = vadd.f32 %v255_v9, %v254_v8 }
  0x1c   : > { %v248_v19 = vadd.f32 %v247_v16, %v246_v12  ;;  %v252_v20 = vadd.f32 %v251_v17, %v250_v15  ;;  %257 = vst [vmem:[#allocation4] sm:$0xff] %v256_v18 }
  0x1e   : > { %249 = vst [vmem:[#allocation2] sm:$0xff] %v248_v19 }
  0x1f   : > { %253 = vst [vmem:[#allocation3] sm:$0xff] %v252_v20 }
  0x20 PF: > { %p428_p8 = scmp.ne.s32.totalorder %s478_s9, 0 }
  0x22   : > { %261 = sbr.rel (%p428_p8) target bundleno = 50 (0x32), region = 40 }
  0x27   : > { %v267_v21 = vld [vmem:[%s538_s23] sm:$0xff]  ;;  %v268_v22 = vld [vmem:[%s538_s23 + $0x8] sm:$0xff]  ;;  %v490_v25 = vmov 0.0   ;;  %v295_v28 = vld [vmem:[#allocation4] sm:$0xff] }
  0x28   : > { %v269_v23 = vld [vmem:[%s543_s26] sm:$0xff]  ;;  %v270_v24 = vld [vmem:[%s543_s26 + $0x8] sm:$0xff]  ;;  %vm271_vm4 = vcmp.ge.f32.partialorder %v267_v21, 0.5  ;;  %vm272_vm5 = vcmp.ge.f32.partialorder %v268_v22, 0.5 }
  0x29   : > { %v273_v26 = vsel %vm271_vm4, 1.0, %v490_v25  ;;  %v274_v27 = vsel %vm272_vm5, 1.0, %v490_v25  ;;  %v296_v29 = vadd.f32 %v270_v24, %v269_v23  ;;  %v287_v32 = vld [vmem:[#allocation2] sm:$0xff]  ;;  %v291_v35 = vld [vmem:[#allocation3] sm:$0xff] }
  0x2a   : > { %vm275_vm6 = vcmp.eq.f32.partialorder %v273_v26, %v269_v23  ;;  %vm276_vm7 = vcmp.eq.f32.partialorder %v274_v27, %v270_v24 }
  0x2b   : > { %v277_v30 = vsel %vm275_vm6, %v269_v23, 0.0  ;;  %v278_v31 = vsel %vm276_vm7, %v270_v24, 0.0  ;;  %v279_v33 = vsel %vm275_vm6, 1.0, %v490_v25  ;;  %v280_v34 = vsel %vm276_vm7, 1.0, %v490_v25 }
  0x2c   : > { %v288_v36 = vadd.f32 %v278_v31, %v277_v30  ;;  %v292_v37 = vadd.f32 %v280_v34, %v279_v33  ;;  %v297_v38 = vadd.f32 %v296_v29, %v295_v28 }
  0x2e   : > { %v289_v39 = vadd.f32 %v288_v36, %v287_v32  ;;  %v293_v40 = vadd.f32 %v292_v37, %v291_v35  ;;  %298 = vst [vmem:[#allocation4] sm:$0xff] %v297_v38 }
  0x30   : > { %290 = vst [vmem:[#allocation2] sm:$0xff] %v289_v39 }
  0x31   : > { %294 = vst [vmem:[#allocation3] sm:$0xff] %v293_v40 }
  0x32 PF: > { %v332_v1 = vlaneseq }
  0x34   : > { %v333_v2 = vand.u32 127, %v332_v1 }
  0x35   : > { %v322_v42 = vld [vmem:[#allocation4] sm:$0xff] }
  0x36   : > { %323 = vadd.xlane.f32.xlu1 %v322_v42  ;;  %vm336_vm8 = vcmp.eq.s32.totalorder %v333_v2, 2  ;;  %vm335_vm9 = vcmp.eq.s32.totalorder %v333_v2, 1  ;;  %vm334_vm10 = vcmp.eq.s32.totalorder %v333_v2, 0 }
  0x37   : > { %v302_v41 = vld [vmem:[#allocation2] sm:$0xff] }
  0x38   : > { %303 = vadd.xlane.f32.xlu0 %v302_v41  ;;  %v312_v43 = vld [vmem:[#allocation3] sm:$0xff] }
  0x40   : > { %313 = vadd.xlane.f32.xlu0 %v312_v43 }
  0xa9   : > { %v324_v45 = vpop.xlane.xlu1 %323 }
  0xaa   : > { %v325_v47 = vrot.slane %v324_v45, 4 }
  0xab   : > { %v304_v44 = vpop.xlane.xlu0 %303 }
  0xac   : > { %v305_v46 = vrot.slane %v304_v44, 4  ;;  %v326_v49 = vadd.f32 %v325_v47, %v324_v45 }
  0xae   : > { %v306_v48 = vadd.f32 %v305_v46, %v304_v44  ;;  %v327_v52 = vrot.slane %v326_v49, 2 }
  0xb0   : > { %v307_v50 = vrot.slane %v306_v48, 2  ;;  %v328_v58 = vadd.f32 %v327_v52, %v326_v49 }
  0xb2   : > { %v308_v51 = vadd.f32 %v307_v50, %v306_v48  ;;  %v329_v61 = vrot.slane %v328_v58, 1 }
  0xb3   : > { %v314_v53 = vpop.xlane.xlu0 %313 }
  0xb4   : > { %v315_v54 = vrot.slane %v314_v53, 4  ;;  %v309_v55 = vrot.slane %v308_v51, 1  ;;  %v330_v0 = vadd.f32 %v329_v61, %v328_v58 }
  0xb6   : > { %v316_v56 = vadd.f32 %v315_v54, %v314_v53  ;;  %v310_v57 = vadd.f32 %v309_v55, %v308_v51 }
  0xb8   : > { %v317_v59 = vrot.slane %v316_v56, 2  ;;  %431 = vpush %v310_v57 }
  0xba   : > { %v318_v60 = vadd.f32 %v317_v59, %v316_v56 }
  0xbc   : > { %v319_v62 = vrot.slane %v318_v60, 1 }
  0xbe   : > { %v320_v63 = vadd.f32 %v319_v62, %v318_v60 }
  0xc0   : > { %433 = vpush %v320_v63 }
  0xc1   : > { %435 = vpush %v330_v0 }
  0xe9   : > { %s432_s27 = spop %431 }
  0xea   : > { %v341_v6 = vstv %s432_s27 }
  0xf1   : > { %s434_s28 = spop %433 }
  0xf2   : > { %v339_v3 = vstv %s434_s28  ;;  %s436_s29 = spop %435 }
  0xf3   : > { %v337_v4 = vstv %s436_s29 }
  0xf4   : > { %v338_v5 = vsel %vm336_vm8, %v337_v4, 0.0 }
  0xf5   : > { %v340_v7 = vsel %vm335_vm9, %v339_v3, %v338_v5 }
  0xf6   : > { %v342_v8 = vsel %vm334_vm10, %v341_v6, %v340_v7 }
  0xf7   : > { %343 = vst [vmem:[%s533_s19] sm:$0xff] %v342_v8 }
  0xf8 PF: > { %s12_s11 = sadd.s32 1, %s486_s11   ;;  %s568_s9 = smov %s482_s10 }
  0xf9   : > { %p9_p9 = scmp.ge.s32.totalorder %s12_s11, 4   ;;  %s569_s10 = smov %s571_s12 }
  0xfb   :  { %11 = sbr.rel (!%p9_p9) target bundleno = 2 (0x2), region = 77 }

</bundles_post_ra>
